<compile_context>
chip_gen: v5e
topology: v5e:2x2
jax: 0.10.0
libtpu: 0.0.40
codegen_flags: <defaults>
</compile_context>

<pallas_src>
import jax
import jax.numpy as jnp
from jax.experimental import pallas as pl
from jax.experimental.pallas import tpu as pltpu

NUM_HEADS = 8


def llm_summary_kernel(entity_ref, summary_ref,
                       w_in_ref, w_vo_ref, b_y_ref,
                       w_out_ref, b_out_ref,
                       out_ref):
    # Pre-LN activation: input projection + attention output (== V at seq_len 1),
    # with both biases and the residual add fused into a single bias b_y.
    y = (jnp.dot(entity_ref[...].astype(w_in_ref.dtype), w_in_ref[...],
                 preferred_element_type=jnp.float32)
         + jnp.dot(summary_ref[...].astype(w_vo_ref.dtype), w_vo_ref[...],
                   preferred_element_type=jnp.float32)
         + b_y_ref[...])

    # LayerNorm (torch defaults: biased variance, eps=1e-5); gamma/beta are folded
    # into w_out/b_out in the wrapper.  Two independent reductions for ILP.
    h = jnp.float32(y.shape[-1])
    s1 = jnp.sum(y, axis=-1, keepdims=True)
    s2 = jnp.sum(y * y, axis=-1, keepdims=True)
    mean = s1 / h
    var = s2 / h - mean * mean
    normed = (y - mean) * jax.lax.rsqrt(var + 1e-5)

    # Output projection (gamma folded into w_out', beta into b_out').
    out_ref[...] = (jnp.dot(normed.astype(w_out_ref.dtype), w_out_ref[...],
                            preferred_element_type=jnp.float32)
                    + b_out_ref[...]).astype(out_ref.dtype)


def _round_up(x, m):
    return ((x + m - 1) // m) * m


def _auto_weights_dtype():
    """bf16 weights on v6e/v7x (MXU-native, halves weight DMA/VMEM residency);
    f32 on v5e whose VPU/EUP have no bf16 (activation casts would be pure cost)."""
    try:
        kind = jax.devices()[0].device_kind.lower()
    except Exception:
        return jnp.float32
    if ("v6" in kind) or ("v7" in kind) or ("7x" in kind):
        return jnp.bfloat16
    return jnp.float32


def llm_summary_processor(entity, summary, params, *,
                          block_b=4096, weights_dtype=None):
    B, d_in = entity.shape
    H = params["w_in"].shape[1]
    if weights_dtype is None:
        weights_dtype = _auto_weights_dtype()

    # ---- wrapper-side algebraic fusion (all in f32) ----
    w_vo = params["wv"] @ params["wo"]                                   # (H, H)
    b_y = params["b_in"] + params["bv"] @ params["wo"] + params["bo"]    # (1, H)
    w_out_f = params["gamma"].T * params["w_out"]                        # (H, H)
    b_out_f = params["beta"] @ params["w_out"] + params["b_out"]         # (1, H)

    w_in = params["w_in"].astype(weights_dtype)
    w_vo = w_vo.astype(weights_dtype)
    w_out_f = w_out_f.astype(weights_dtype)
    b_y = b_y.astype(jnp.float32)
    b_out_f = b_out_f.astype(jnp.float32)

    # ---- batch tiling ----
    # Biggest tile that fits (default 4096 rows), capped near ceil(B/2) so the grid
    # has >= 2 steps and the "parallel" batch axis shards across v7x's two TCs.
    bt = max(8, _round_up(pl.cdiv(B, 2), 8))
    bt = min(bt, max(8, _round_up(block_b, 8)))
    grid = pl.cdiv(B, bt)          # ragged last tile: Pallas masks OOB loads/stores

    def row_spec(d):               # activation/output tiles: advance with the grid
        return pl.BlockSpec((bt, d), lambda i: (i, 0))

    def full_spec(shape):          # weights/biases: VMEM-resident across the grid
        return pl.BlockSpec(shape, lambda i: (0, 0))

    # VMEM budget: double-buffered activation/output tiles + weights, plus slack.
    wbytes = 2 if weights_dtype == jnp.bfloat16 else 4
    act_bytes = bt * (d_in + H + H) * 4
    weight_bytes = (d_in * H + 2 * H * H) * wbytes + 2 * H * 4
    vmem_limit = int(max(2 * act_bytes + 2 * weight_bytes + (2 << 20), 16 << 20))

    return pl.pallas_call(
        llm_summary_kernel,
        out_shape=jax.ShapeDtypeStruct((B, H), jnp.float32),
        grid=(grid,),
        in_specs=[
            row_spec(d_in),            # entity tile
            row_spec(H),               # summary tile
            full_spec((d_in, H)),      # w_in
            full_spec((H, H)),         # w_vo   (= wv @ wo)
            full_spec((1, H)),         # b_y    (= b_in + bv @ wo + bo)
            full_spec((H, H)),         # w_out' (gamma folded)
            full_spec((1, H)),         # b_out' (beta folded)
        ],
        out_specs=row_spec(H),
        compiler_params=pltpu.CompilerParams(
            dimension_semantics=("parallel",),
            vmem_limit_bytes=vmem_limit),
        # Tuning knob: if profiling shows exposed DMA at very large B, add
        # pipeline_mode=pl.Buffered(3) to the row specs and sweep 2 vs 3.
    )(entity, summary, w_in, w_vo, b_y, w_out_f, b_out_f)


def reference(entity, summary, p):
    """Pure-JAX reference of the ORIGINAL (unfused) module, incl. the q/k path."""
    proj = entity @ p["w_in"] + p["b_in"]
    q = proj @ p["wq"] + p["bq"]
    k = summary @ p["wk"] + p["bk"]
    v = summary @ p["wv"] + p["bv"]
    B, H = q.shape
    hd = H // NUM_HEADS
    qh = q.reshape(B, NUM_HEADS, hd)
    kh = k.reshape(B, NUM_HEADS, hd)
    vh = v.reshape(B, NUM_HEADS, hd)
    scores = jnp.sum(qh * kh, axis=-1, keepdims=True) / jnp.sqrt(jnp.float32(hd))
    probs = jax.nn.softmax(scores, axis=-1)        # single key -> exactly 1.0
    attn = (probs * vh).reshape(B, H)
    attn_out = attn @ p["wo"] + p["bo"]
    y = attn_out + proj
    mean = y.mean(-1, keepdims=True)
    var = ((y - mean) ** 2).mean(-1, keepdims=True)
    enhanced = (y - mean) / jnp.sqrt(var + 1e-5) * p["gamma"] + p["beta"]
    return enhanced @ p["w_out"] + p["b_out"]


def init_params(key, input_dim, hidden):
    ks = jax.random.split(key, 16)
    n = lambda k, shape, s=0.05: (s * jax.random.normal(k, shape)).astype(jnp.float32)
    return {
        "w_in": n(ks[0], (input_dim, hidden)),
        "b_in": n(ks[1], (1, hidden)),
        "wq": n(ks[2], (hidden, hidden)),
        "bq": n(ks[3], (1, hidden)),
        "wk": n(ks[4], (hidden, hidden)),
        "bk": n(ks[5], (1, hidden)),
        "wv": n(ks[6], (hidden, hidden)),
        "bv": n(ks[7], (1, hidden)),
        "wo": n(ks[8], (hidden, hidden)),
        "bo": n(ks[9], (1, hidden)),
        "gamma": (1.0 + 0.1 * jax.random.normal(ks[10], (1, hidden))).astype(jnp.float32),
        "beta": n(ks[11], (1, hidden)),
        "w_out": n(ks[12], (hidden, hidden)),
        "b_out": n(ks[13], (1, hidden)),
    }


if __name__ == "__main__":
    INPUT_DIM, HIDDEN = 16, 64     # hidden must be divisible by 8 heads

    key = jax.random.PRNGKey(0)
    k_e, k_s, k_p, k_e2, k_s2 = jax.random.split(key, 5)
    params = init_params(k_p, INPUT_DIM, HIDDEN)

    # (1) aligned batch, f32 weights -> strict numerical check vs. unfused reference
    B = 8
    entity = jax.random.normal(k_e, (B, INPUT_DIM), dtype=jnp.float32)
    summary = jax.random.normal(k_s, (B, HIDDEN), dtype=jnp.float32)
    out = jax.block_until_ready(
        llm_summary_processor(entity, summary, params, weights_dtype=jnp.float32))
    ref = reference(entity, summary, params)
    assert out.shape == (B, HIDDEN)
    assert jnp.allclose(out, ref, rtol=1e-4, atol=1e-4), "f32 mismatch vs reference"

    # (2) ragged batch (exercises the masked last tile, no wrapper padding) with the
    #     chip-appropriate default weight dtype (bf16 on v6e/v7x, f32 on v5e).
    B2 = 13
    entity2 = jax.random.normal(k_e2, (B2, INPUT_DIM), dtype=jnp.float32)
    summary2 = jax.random.normal(k_s2, (B2, HIDDEN), dtype=jnp.float32)
    out2 = jax.block_until_ready(llm_summary_processor(entity2, summary2, params))
    ref2 = reference(entity2, summary2, params)
    tol = 1e-4 if _auto_weights_dtype() == jnp.float32 else 3e-2
    assert out2.shape == (B2, HIDDEN)
    assert jnp.allclose(out2, ref2, rtol=tol, atol=tol), "ragged/auto-dtype mismatch"

    print("KERNEL_OK")
</pallas_src>

<mosaic_0001>
module attributes {stable_mosaic.version = 11 : i64} {
  func.func @llm_summary_kernel(%arg0: i32, %arg1: memref<8x16xf32, #tpu.memory_space<vmem>>, %arg2: memref<8x64xf32, #tpu.memory_space<vmem>>, %arg3: memref<16x64xf32, #tpu.memory_space<vmem>>, %arg4: memref<64x64xf32, #tpu.memory_space<vmem>>, %arg5: memref<1x64xf32, #tpu.memory_space<vmem>>, %arg6: memref<64x64xf32, #tpu.memory_space<vmem>>, %arg7: memref<1x64xf32, #tpu.memory_space<vmem>>, %arg8: memref<8x64xf32, #tpu.memory_space<vmem>>) attributes {dimension_semantics = [#tpu.dimension_semantics<parallel>], iteration_bounds = array<i64: 1>, scalar_prefetch = 0 : i64, scratch_operands = 0 : i64, tpu.core_type = #tpu.core_type<tc>, window_params = [{transform_indices = @transform_0, window_bounds = array<i64: 8, 16>}, {transform_indices = @transform_1, window_bounds = array<i64: 8, 64>}, {pipeline_mode = #tpu.pipeline_mode<synchronous>, transform_indices = @transform_2, window_bounds = array<i64: 16, 64>}, {pipeline_mode = #tpu.pipeline_mode<synchronous>, transform_indices = @transform_3, window_bounds = array<i64: 64, 64>}, {pipeline_mode = #tpu.pipeline_mode<synchronous>, transform_indices = @transform_4, window_bounds = array<i64: 1, 64>}, {pipeline_mode = #tpu.pipeline_mode<synchronous>, transform_indices = @transform_5, window_bounds = array<i64: 64, 64>}, {pipeline_mode = #tpu.pipeline_mode<synchronous>, transform_indices = @transform_6, window_bounds = array<i64: 1, 64>}, {transform_indices = @transform_7, window_bounds = array<i64: 8, 64>}]} {
    %c0 = arith.constant 0 : index
    %c0_0 = arith.constant 0 : index
    %0 = vector.load %arg1[%c0, %c0_0] : memref<8x16xf32, #tpu.memory_space<vmem>>, vector<8x16xf32>
    %c0_1 = arith.constant 0 : index
    %c0_2 = arith.constant 0 : index
    %1 = vector.load %arg3[%c0_1, %c0_2] : memref<16x64xf32, #tpu.memory_space<vmem>>, vector<16x64xf32>
    %cst = arith.constant dense<0.000000e+00> : vector<8x64xf32>
    %2 = tpu.matmul %0, %1, %cst {dimension_numbers = #tpu.dot_dimension_numbers<[1], [0], [0], [1], [0, 0, 1, 1], [], []>} : vector<8x16xf32>, vector<16x64xf32>, vector<8x64xf32> -> vector<8x64xf32>
    %c0_3 = arith.constant 0 : index
    %c0_4 = arith.constant 0 : index
    %3 = vector.load %arg2[%c0_3, %c0_4] : memref<8x64xf32, #tpu.memory_space<vmem>>, vector<8x64xf32>
    %c0_5 = arith.constant 0 : index
    %c0_6 = arith.constant 0 : index
    %4 = vector.load %arg4[%c0_5, %c0_6] : memref<64x64xf32, #tpu.memory_space<vmem>>, vector<64x64xf32>
    %cst_7 = arith.constant dense<0.000000e+00> : vector<8x64xf32>
    %5 = tpu.matmul %3, %4, %cst_7 {dimension_numbers = #tpu.dot_dimension_numbers<[1], [0], [0], [1], [0, 0, 1, 1], [], []>} : vector<8x64xf32>, vector<64x64xf32>, vector<8x64xf32> -> vector<8x64xf32>
    %6 = arith.addf %2, %5 : vector<8x64xf32>
    %c0_8 = arith.constant 0 : index
    %c0_9 = arith.constant 0 : index
    %7 = vector.load %arg5[%c0_8, %c0_9] : memref<1x64xf32, #tpu.memory_space<vmem>>, vector<1x64xf32>
    %8 = vector.broadcast %7 : vector<1x64xf32> to vector<8x64xf32>
    %9 = arith.addf %6, %8 : vector<8x64xf32>
    %cst_10 = arith.constant dense<0.000000e+00> : vector<8xf32>
    %10 = vector.multi_reduction <add>, %9, %cst_10 [1] : vector<8x64xf32> to vector<8xf32>
    %11 = vector.shape_cast %10 : vector<8xf32> to vector<8x1xf32>
    %12 = arith.mulf %9, %9 : vector<8x64xf32>
    %cst_11 = arith.constant dense<0.000000e+00> : vector<8xf32>
    %13 = vector.multi_reduction <add>, %12, %cst_11 [1] : vector<8x64xf32> to vector<8xf32>
    %14 = vector.shape_cast %13 : vector<8xf32> to vector<8x1xf32>
    %cst_12 = arith.constant 6.400000e+01 : f32
    %15 = vector.broadcast %cst_12 : f32 to vector<8x1xf32>
    %16 = arith.divf %11, %15 : vector<8x1xf32>
    %cst_13 = arith.constant 6.400000e+01 : f32
    %17 = vector.broadcast %cst_13 : f32 to vector<8x1xf32>
    %18 = arith.divf %14, %17 : vector<8x1xf32>
    %19 = arith.mulf %16, %16 : vector<8x1xf32>
    %20 = arith.subf %18, %19 : vector<8x1xf32>
    %21 = vector.broadcast %16 : vector<8x1xf32> to vector<8x64xf32>
    %22 = arith.subf %9, %21 : vector<8x64xf32>
    %cst_14 = arith.constant 9.99999974E-6 : f32
    %23 = vector.broadcast %cst_14 : f32 to vector<8x1xf32>
    %24 = arith.addf %20, %23 : vector<8x1xf32>
    %25 = math.rsqrt %24 : vector<8x1xf32>
    %26 = vector.broadcast %25 : vector<8x1xf32> to vector<8x64xf32>
    %27 = arith.mulf %22, %26 : vector<8x64xf32>
    %c0_15 = arith.constant 0 : index
    %c0_16 = arith.constant 0 : index
    %28 = vector.load %arg6[%c0_15, %c0_16] : memref<64x64xf32, #tpu.memory_space<vmem>>, vector<64x64xf32>
    %cst_17 = arith.constant dense<0.000000e+00> : vector<8x64xf32>
    %29 = tpu.matmul %27, %28, %cst_17 {dimension_numbers = #tpu.dot_dimension_numbers<[1], [0], [0], [1], [0, 0, 1, 1], [], []>} : vector<8x64xf32>, vector<64x64xf32>, vector<8x64xf32> -> vector<8x64xf32>
    %c0_18 = arith.constant 0 : index
    %c0_19 = arith.constant 0 : index
    %30 = vector.load %arg7[%c0_18, %c0_19] : memref<1x64xf32, #tpu.memory_space<vmem>>, vector<1x64xf32>
    %31 = vector.broadcast %30 : vector<1x64xf32> to vector<8x64xf32>
    %32 = arith.addf %29, %31 : vector<8x64xf32>
    %c0_20 = arith.constant 0 : index
    %c0_21 = arith.constant 0 : index
    %33 = vector.load %arg8[%c0_20, %c0_21] : memref<8x64xf32, #tpu.memory_space<vmem>>, vector<8x64xf32>
    tpu.vector_store %arg8[%c0_20, %c0_21], %32 {strides = array<i32>} : memref<8x64xf32, #tpu.memory_space<vmem>>, vector<8x64xf32>,
    return
  }
  func.func @transform_0(%arg0: i32) -> (i32, i32) {
    %c0_i32 = arith.constant 0 : i32
    %c0_i32_0 = arith.constant 0 : i32
    return %arg0, %c0_i32 : i32, i32
  }
  func.func @transform_1(%arg0: i32) -> (i32, i32) {
    %c0_i32 = arith.constant 0 : i32
    %c0_i32_0 = arith.constant 0 : i32
    return %arg0, %c0_i32 : i32, i32
  }
  func.func @transform_2(%arg0: i32) -> (i32, i32) {
    %c0_i32 = arith.constant 0 : i32
    %c0_i32_0 = arith.constant 0 : i32
    %c0_i32_1 = arith.constant 0 : i32
    return %c0_i32, %c0_i32_0 : i32, i32
  }
  func.func @transform_3(%arg0: i32) -> (i32, i32) {
    %c0_i32 = arith.constant 0 : i32
    %c0_i32_0 = arith.constant 0 : i32
    %c0_i32_1 = arith.constant 0 : i32
    return %c0_i32, %c0_i32_0 : i32, i32
  }
  func.func @transform_4(%arg0: i32) -> (i32, i32) {
    %c0_i32 = arith.constant 0 : i32
    %c0_i32_0 = arith.constant 0 : i32
    %c0_i32_1 = arith.constant 0 : i32
    return %c0_i32, %c0_i32_0 : i32, i32
  }
  func.func @transform_5(%arg0: i32) -> (i32, i32) {
    %c0_i32 = arith.constant 0 : i32
    %c0_i32_0 = arith.constant 0 : i32
    %c0_i32_1 = arith.constant 0 : i32
    return %c0_i32, %c0_i32_0 : i32, i32
  }
  func.func @transform_6(%arg0: i32) -> (i32, i32) {
    %c0_i32 = arith.constant 0 : i32
    %c0_i32_0 = arith.constant 0 : i32
    %c0_i32_1 = arith.constant 0 : i32
    return %c0_i32, %c0_i32_0 : i32, i32
  }
  func.func @transform_7(%arg0: i32) -> (i32, i32) {
    %c0_i32 = arith.constant 0 : i32
    %c0_i32_0 = arith.constant 0 : i32
    return %arg0, %c0_i32 : i32, i32
  }
}

</mosaic_0001>

<bundles_post_ra>
// kernel: tpu_custom_call.1
= control target key start
LH: loop header
LB: loop body
LE: loop exit
PB: predicated region body
PF: predicated region fallthrough
CT: control target
= control target key end

     0   :  { %12 = vsyncpa [#allocation3], 0  ;;  %s500_s0 = inlined_call_operand.hbm [shape: f32[8,16], index: 0, kind: input, shape index: {}]   ;;  %s501_s1 = inlined_call_operand.hbm [shape: f32[8,64], index: 1, kind: input, shape index: {}]   ;;  %s502_s2 = inlined_call_operand.hbm [shape: f32[16,64], index: 2, kind: input, shape index: {}]   ;;  %s503_s3 = inlined_call_operand.hbm [shape: f32[64,64], index: 3, kind: input, shape index: {}]   ;;  %s504_s4 = inlined_call_operand.vmem [shape: f32[1,64], index: 4, kind: input, shape index: {}]   ;;  %s505_s5 = inlined_call_operand.hbm [shape: f32[64,64], index: 5, kind: input, shape index: {}]   ;;  %s506_s6 = inlined_call_operand.vmem [shape: f32[1,64], index: 6, kind: input, shape index: {}]   ;;  %s507_s7 = inlined_call_operand.hbm [shape: f32[8,64], index: 7, kind: output, shape index: {}]  }
   0x1   :  { %13 = vsyncpa [#allocation6], 0 }
   0x2   :  { %14 = vsyncpa [#allocation9], 0  ;;  %s32_s26 = sshll.u32 %s501_s1, 4  ;;  %s33_s26 = int_to_ptr.hbm [resolvable:$true] %s32_s26 }
   0x3   :  { %15 = vsyncpa [#allocation4], 0  ;;  %s422_s27 = smov [#allocation5]   ;;  %s55_s8 = sshll.u32 %s503_s3, 4  ;;  %s56_s8 = int_to_ptr.hbm [resolvable:$true] %s55_s8 }
   0x4   :  { %s34_s28 = sshll.u32 %s422_s27, 4  ;;  %s423_s9 = smov [#allocation8]   ;;  %s35_s28 = int_to_ptr.vmem [resolvable:$true] %s34_s28 }
   0x5   :  { %37 = dma.hbm_to_vmem [thread:$0]  %s33_s26, 128, %s35_s28, [#allocation6]  }
   0x6   :  { %s57_s10 = sshll.u32 %s423_s9, 4  ;;  %s21_s13 = sshll.u32 %s500_s0, 4  ;;  %s58_s10 = int_to_ptr.vmem [resolvable:$true] %s57_s10  ;;  %s22_s13 = int_to_ptr.hbm [resolvable:$true] %s21_s13 }
   0x7   :  { %s424_s1 = smov 128   ;;  %s425_s14 = smov 8  }
   0x8   :  { %63 = dma.hbm_to_vmem [thread:$0]  %s56_s8, 1024, %s58_s10, [#allocation9], %s424_s1, %s424_s1, %s425_s14  }
   0x9   :  { %s42_s17 = sshll.u32 %s502_s2, 4  ;;  %s426_s18 = smov [#allocation2]   ;;  %s43_s17 = int_to_ptr.hbm [resolvable:$true] %s42_s17 }
   0xa   :  { %s23_s19 = sshll.u32 %s426_s18, 4  ;;  %s427_s3 = smov [#allocation7]   ;;  %s24_s19 = int_to_ptr.vmem [resolvable:$true] %s23_s19 }
   0xb   :  { %26 = dma.hbm_to_vmem [thread:$0]  %s22_s13, 128, %s24_s19, [#allocation3]  }
   0xc   :  { %s44_s20 = sshll.u32 %s427_s3, 4  ;;  %s70_s0 = sshll.u32 %s505_s5, 4  ;;  %s45_s20 = int_to_ptr.vmem [resolvable:$true] %s44_s20  ;;  %s71_s0 = int_to_ptr.hbm [resolvable:$true] %s70_s0 }
   0xd   :  { %50 = dma.hbm_to_vmem [thread:$0]  %s43_s17, 256, %s45_s20, [#allocation6], %s424_s1, %s424_s1, %s425_s14  }
   0xe   :  { %s428_s23 = smov [#allocation10]  }
   0xf   :  { %s72_s24 = sshll.u32 %s428_s23, 4  ;;  %s73_s24 = int_to_ptr.vmem [resolvable:$true] %s72_s24 }
  0x10   :  { %78 = dma.hbm_to_vmem [thread:$0]  %s71_s0, 1024, %s73_s24, [#allocation9], %s424_s1, %s424_s1, %s425_s14  }
  0x11   :  { %414 = dma.done.wait [#allocation3], 128  }
  0x12   :  { %415 = vsyncadd [#allocation3], 4294967168 }
  0x13   :  { %416 = dma.done.wait [#allocation6], 384  }
  0x14   :  { %417 = vsyncadd [#allocation6], 4294966912 }
  0x15   :  { %418 = dma.done.wait [#allocation9], 2048  }
  0x16   :  { %419 = vsyncadd [#allocation9], 4294965248  ;;  %v112_v0 = vld [vmem:[#allocation8 + $0x38] sm:$0xff]  ;;  %v111_v1 = vld [vmem:[#allocation8 + $0x30] sm:$0xff]  ;;  %vm137_vm0 = vcmask 130048   ;;  %vm113_vm1 = vcmask 523264  }
  0x17   :  { %125 = vmatpush.msra.mxu0 %v112_v0  ;;  %v110_v2 = vld [vmem:[#allocation8 + $0x28] sm:$0xff]  ;;  %v103_v3 = vld [vmem:[#allocation7 + $0x8] sm:$0xff]  ;;  %v102_v4 = vld [vmem:[#allocation7] sm:$0xff]  ;;  %v429_v20 = vmov 64.0   ;;  %s430_s26 = smov [#allocation11]   ;;  %s240_s30 = sshll.u32 %s507_s7, 4  ;;  %s241_s30 = int_to_ptr.hbm [resolvable:$true] %s240_s30 }
  0x18   :  { %155 = vmatpush.msra.mxu1 %v103_v3  ;;  %v101_v5 = vld [vmem:[#allocation2] sm:$0xff]  ;;  %v108_v7 = vld [vmem:[#allocation8 + $0x18] sm:$0xff]  ;;  %v107_v8 = vld [vmem:[#allocation8 + $0x10] sm:$0xff]  ;;  %266 = vrcp.f32 %v429_v20  ;;  %s238_s27 = sshll.u32 %s430_s26, 4  ;;  %s239_s27 = int_to_ptr.vmem [resolvable:$true] %s238_s27 }
  0x19   :  { %126 = vmatpush.msra.mxu0 %v111_v1  ;;  %v109_v6 = vld [vmem:[#allocation8 + $0x20] sm:$0xff]  ;;  %v106_v9 = vld [vmem:[#allocation8 + $0x8] sm:$0xff]  ;;  %v204_v23 = vld [vmem:[#allocation10 + $0x38] sm:$0xff] }
  0x1a   :  { %156 = vmatpush.msra.mxu1 %v102_v4  ;;  %v105_v10 = vld [vmem:[#allocation8] sm:$0xff]  ;;  %v104_v11 = vld [vmem:[#allocation5] sm:$0xff]  ;;  %220 = vmatpush.msra.mxu2 %v204_v23  ;;  %v203_v24 = vld [vmem:[#allocation10 + $0x30] sm:$0xff] }
  0x1b   :  { %127 = vmatpush.msra.mxu0 %v110_v2  ;;  %253 = vmatmul.msk.f32.vlgmr.msra.gmra.mxu1 %vm137_vm0, %v101_v5  ;;  %v264_v13 = vld [vmem:[%s504_s4] ss:$0 sm:$0xff]  ;;  %v202_v26 = vld [vmem:[#allocation10 + $0x28] sm:$0xff]  ;;  %v200_v29 = vld [vmem:[#allocation10 + $0x18] sm:$0xff] }
  0x1c   :  { %221 = vmatpush.msra.mxu2 %v203_v24  ;;  %v201_v27 = vld [vmem:[#allocation10 + $0x20] sm:$0xff]  ;;  %v199_v30 = vld [vmem:[#allocation10 + $0x10] sm:$0xff]  ;;  %v198_v31 = vld [vmem:[#allocation10 + $0x8] sm:$0xff] }
  0x1d   :  { %128 = vmatpush.msra.mxu0 %v109_v6  ;;  %v197_v33 = vld [vmem:[#allocation10] sm:$0xff] }
  0x1e   :  { %v267_v21 = vpop.eup %266  ;;  %222 = vmatpush.msra.mxu2 %v202_v26  ;;  %v265_v51 = vld [vmem:[%s506_s6] ss:$0 sm:$0xff] }
  0x1f   :  { %129 = vmatpush.msra.mxu0 %v108_v7  ;;  %v174_v22 = vmul.f32 64.0, %v267_v21  ;;  %vm178_vm2 = vweird.f32 %v267_v21 }
  0x20   :  { %223 = vmatpush.msra.mxu2 %v201_v27 }
  0x21   :  { %130 = vmatpush.msra.mxu0 %v107_v8  ;;  %v175_v25 = vsub.f32 1.0, %v174_v22 }
  0x22   :  { %224 = vmatpush.msra.mxu2 %v200_v29 }
  0x23   :  { %131 = vmatpush.msra.mxu0 %v106_v9  ;;  %v176_v28 = vmul.f32 %v267_v21, %v175_v25 }
  0x24   :  { %225 = vmatpush.msra.mxu2 %v199_v30 }
  0x25   :  { %132 = vmatpush.msra.mxu0 %v105_v10  ;;  %v177_v32 = vadd.f32 %v267_v21, %v176_v28 }
  0x26   :  { %252 = vmatmul.msk.f32.vlgmr.msra.gmra.mxu0 %vm113_vm1, %v104_v11  ;;  %226 = vmatpush.msra.mxu2 %v198_v31 }
  0x27   :  { %v179_v35 = vsel %vm178_vm2, %v267_v21, %v177_v32 }
  0x28   :  { %227 = vmatpush.msra.mxu2 %v197_v33 }
  0x98   :  { %v158_v12 = vpop.f32.mrf.mxu1 }
  0xa3   :  { %v134_v14 = vpop.f32.mrf.mxu0 }
  0xa4   :  { %v159_v15 = vadd.f32 %v158_v12, %v134_v14 }
  0xa6   :  { %v165_v16 = vadd.f32 %v264_v13, %v159_v15 }
  0xa8   :  { %v166_v17 = vsel %vm113_vm1, %v165_v16, 0.0  ;;  %v169_v18 = vmul.f32 %v165_v16, %v165_v16 }
  0xa9   :  { %167 = vadd.xlane.f32.xlu0 %v166_v17 }
  0xaa   :  { %v170_v19 = vsel %vm113_vm1, %v169_v18, 0.0 }
  0xb1   :  { %171 = vadd.xlane.f32.xlu0 %v170_v19 }
 0x11c   :  { %v168_v34 = vpop.xlane.xlu0 %167 }
 0x11d   :  { %v180_v36 = vmul.f32 %v179_v35, %v168_v34 }
 0x11f   :  { %v182_v38 = vmul.f32 %v180_v36, %v180_v36  ;;  %v184_v48 = vsub.f32 %v165_v16, %v180_v36 }
 0x124   :  { %v172_v37 = vpop.xlane.xlu0 %171 }
 0x125   :  { %v181_v39 = vmul.f32 %v179_v35, %v172_v37 }
 0x127   :  { %v183_v40 = vsub.f32 %v181_v39, %v182_v38 }
 0x129   :  { %v185_v41 = vadd.f32 1e-05, %v183_v40 }
 0x12b   :  { %268 = vrsqrt.f32 %v185_v41  ;;  %vm192_vm4 = vweird.f32 %v185_v41 }
 0x131   :  { %v269_v42 = vpop.eup %268 }
 0x132   :  { %v187_v43 = vmul.f32 %v269_v42, %v185_v41  ;;  %vm193_vm3 = vweird.f32 %v269_v42 }
 0x133   :  { %vm194_vm5 = vmor %vm192_vm4, %vm193_vm3 }
 0x134   :  { %v188_v44 = vmul.f32 %v269_v42, %v187_v43 }
 0x136   :  { %v189_v45 = vmul.f32 0.5, %v188_v44 }
 0x138   :  { %v190_v46 = vsub.f32 1.5, %v189_v45 }
 0x13a   :  { %v191_v47 = vmul.f32 %v269_v42, %v190_v46 }
 0x13c   :  { %v195_v49 = vsel %vm194_vm5, %v269_v42, %v191_v47 }
 0x13d   :  { %v196_v50 = vmul.f32 %v195_v49, %v184_v48 }
 0x13f   :  { %254 = vmatmul.msk.f32.vlgmr.msra.gmra.mxu2 %vm113_vm1, %v196_v50 }
 0x1c2   :  { %v229_v52 = vpop.f32.mrf.mxu2 }
 0x1c3   :  { %v230_v53 = vadd.f32 %v265_v51, %v229_v52 }
 0x1c5   :  { %232 = vst.msk [vmem:[#allocation11] sm:$0xff] %vm113_vm1, %v230_v53 }
 0x1c6   :  { %243 = dma.vmem_to_hbm [thread:$0]  %s239_s27, 128, %s241_s30, [#allocation4]  }
 0x1c7   :  { %420 = dma.done.wait [#allocation4], 128  }
 0x1c8   :  { %421 = vsyncadd [#allocation4], 4294967168 }
 0x1c9   :  { %248 = vsyncpa [#allocation3], 1 }
 0x1ca   :  { %249 = vsyncpa [#allocation6], 1 }
 0x1cb   :  { %250 = vsyncpa [#allocation9], 1 }
 0x1cc   :  { %251 = vsyncpa [#allocation4], 1 }

</bundles_post_ra>
